<compile_context>
chip_gen: v6e
topology: v6e:2x2x1
jax: 0.10.0
libtpu: 0.0.40
codegen_flags: <defaults>
</compile_context>

<pallas_src>
import math

import jax
import jax.numpy as jnp
from jax.experimental import pallas as pl
from jax.experimental.pallas import tpu as pltpu

# ---------------------------------------------------------------------------
# Static configuration (small shapes implied by the module)
# ---------------------------------------------------------------------------
T = 8                       # seq_len
B = 2                       # batch
E = 32                      # embed_dim
H = 4                       # num_heads
HD = E // H                 # head_dim
SCALING = HD ** (-0.5)
NEG_INF = -1e30             # finite "-inf"


# ---------------------------------------------------------------------------
# Fused attention kernel
# ---------------------------------------------------------------------------
def attention_kernel(xq_ref, xk_ref, mask_ref,
                     wq_t_ref, bq_ref, wkv_t_ref, bkv_ref,
                     wo_t_ref, bo_ref, out_ref):
    """xq: (bb, Tq, E), xk: (bb, Tk, E), mask: (bb, Tq, Tk) additive float."""
    bb, tq, e = xq_ref.shape
    tk = xk_ref.shape[1]

    xq = xq_ref[...].reshape(bb * tq, e)
    xk = xk_ref[...].reshape(bb * tk, e)

    # Q projection; bias then a single scaling multiply for the whole tensor.
    q = (jnp.dot(xq, wq_t_ref[...], preferred_element_type=jnp.float32)
         + bq_ref[...]) * SCALING                                  # (bb*Tq, E)

    # Fused K/V projection: one (bb*Tk, E) x (E, 2E) MXU op.
    kv = (jnp.dot(xk, wkv_t_ref[...], preferred_element_type=jnp.float32)
          + bkv_ref[...])                                          # (bb*Tk, 2E)

    q = q.reshape(bb, tq, e)
    k = kv[:, :e].reshape(bb, tk, e)
    v = kv[:, e:].reshape(bb, tk, e)

    # Gather heads into a single leading batch axis: (H*bb, T, HD).
    # (static lane slices + leading-axis concat; order is head-major)
    qh = jnp.concatenate([q[..., h * HD:(h + 1) * HD] for h in range(H)], axis=0)
    kh = jnp.concatenate([k[..., h * HD:(h + 1) * HD] for h in range(H)], axis=0)
    vh = jnp.concatenate([v[..., h * HD:(h + 1) * HD] for h in range(H)], axis=0)

    # One batched score matmul + ONE softmax for all heads.
    mask_all = jnp.concatenate([mask_ref[...]] * H, axis=0)        # (H*bb, Tq, Tk)
    s = jnp.einsum('bqd,bkd->bqk', qh, kh,
                   preferred_element_type=jnp.float32)             # (H*bb, Tq, Tk)
    s = s + mask_all
    s = s - jnp.max(s, axis=-1, keepdims=True)
    p = jnp.exp(s)
    p = p * pl.reciprocal(jnp.sum(p, axis=-1, keepdims=True), approx=True)

    # One batched context matmul for all heads.
    ctx = jnp.einsum('bqk,bkd->bqd', p, vh,
                     preferred_element_type=jnp.float32)           # (H*bb, Tq, HD)

    # Re-assemble heads along the lane axis and apply the output projection.
    ctx = jnp.concatenate([ctx[h * bb:(h + 1) * bb] for h in range(H)],
                          axis=-1)                                 # (bb, Tq, E)
    out = (jnp.dot(ctx.reshape(bb * tq, e), wo_t_ref[...],
                   preferred_element_type=jnp.float32) + bo_ref[...])
    out_ref[...] = out.reshape(bb, tq, e)


# ---------------------------------------------------------------------------
# Wrapper
# ---------------------------------------------------------------------------
def _is_v7x():
    """Gate the batch-parallel grid on chips with 2 TensorCores (v7x)."""
    try:
        kind = (getattr(jax.devices()[0], "device_kind", "") or "").lower()
        return ("v7" in kind) or ("tpu7" in kind)
    except Exception:
        return False


def attention(query, key, key_padding_mask, attn_mask, params):
    """query/key: (T, B, E); key_padding_mask: (B, Tk); attn_mask: (Tq, Tk).

    Returns (Tq, B, E), matching the PyTorch module.
    """
    if key is None:
        key = query
    tq, bsz, e = query.shape
    tk = key.shape[0]

    # Layout plumbing (outside the kernel): (T, B, E) -> (B, T, E).
    xq = jnp.transpose(query, (1, 0, 2)).astype(jnp.float32)
    xk = jnp.transpose(key, (1, 0, 2)).astype(jnp.float32)

    # Additive mask precomputed in the wrapper; finite NEG_INF (no -inf NaNs).
    masked = jnp.zeros((bsz, tq, tk), jnp.bool_)
    if attn_mask is not None:
        masked = masked | (attn_mask != 0)[None, :, :]
    if key_padding_mask is not None:
        masked = masked | (key_padding_mask != 0)[:, None, :]
    add_mask = jnp.where(masked, jnp.float32(NEG_INF), jnp.float32(0.0))

    # Weight prep: transpose to (in, out), fuse K/V, pre-shape biases to (1, D).
    wq_t = params['wq'].T                                               # (E, E)
    wkv_t = jnp.concatenate([params['wk'].T, params['wv'].T], axis=1)   # (E, 2E)
    wo_t = params['wo'].T                                               # (E, E)
    bq = params['bq'].reshape(1, e)
    bkv = jnp.concatenate([params['bk'], params['bv']]).reshape(1, 2 * e)
    bo = params['bo'].reshape(1, e)

    inputs = (xq, xk, add_mask, wq_t, bq, wkv_t, bkv, wo_t, bo)
    out_shape = jax.ShapeDtypeStruct((bsz, tq, e), jnp.float32)

    if _is_v7x() and bsz > 1:
        # v7x has 2 TensorCores: shard the batch across them.
        in_specs = [
            pl.BlockSpec((1, tq, e), lambda b: (b, 0, 0)),      # xq
            pl.BlockSpec((1, tk, e), lambda b: (b, 0, 0)),      # xk
            pl.BlockSpec((1, tq, tk), lambda b: (b, 0, 0)),     # add_mask
            pl.BlockSpec((e, e), lambda b: (0, 0)),             # wq_t
            pl.BlockSpec((1, e), lambda b: (0, 0)),             # bq
            pl.BlockSpec((e, 2 * e), lambda b: (0, 0)),         # wkv_t
            pl.BlockSpec((1, 2 * e), lambda b: (0, 0)),         # bkv
            pl.BlockSpec((e, e), lambda b: (0, 0)),             # wo_t
            pl.BlockSpec((1, e), lambda b: (0, 0)),             # bo
        ]
        fn = pl.pallas_call(
            attention_kernel,
            out_shape=out_shape,
            grid=(bsz,),
            in_specs=in_specs,
            out_specs=pl.BlockSpec((1, tq, e), lambda b: (b, 0, 0)),
            compiler_params=pltpu.CompilerParams(
                dimension_semantics=("parallel",)),
        )
    else:
        # v5e / v6e (single TensorCore): one invocation, everything in VMEM.
        vmem = pl.BlockSpec(memory_space=pltpu.MemorySpace.VMEM)
        fn = pl.pallas_call(
            attention_kernel,
            out_shape=out_shape,
            in_specs=[vmem] * len(inputs),
            out_specs=vmem,
        )

    out_bte = fn(*inputs)
    return jnp.transpose(out_bte, (1, 0, 2))          # back to (Tq, B, E)


# ---------------------------------------------------------------------------
# Pure-JAX reference (mirrors the PyTorch forward exactly)
# ---------------------------------------------------------------------------
def attention_reference(query, key, key_padding_mask, attn_mask, p):
    tq, bsz, e = query.shape
    tk = key.shape[0]
    q = query @ p['wq'].T + p['bq']
    k = key @ p['wk'].T + p['bk']
    v = key @ p['wv'].T + p['bv']

    def _shape(t, sl):
        return t.reshape(sl, bsz * H, HD).transpose(1, 0, 2)   # (B*H, T, HD)

    q = _shape(q, tq) * SCALING
    k = _shape(k, tk)
    v = _shape(v, tk)

    mask = jnp.zeros((bsz * H, tq, tk), jnp.bool_)
    if attn_mask is not None:
        mask = mask | (attn_mask != 0)[None, :, :]
    if key_padding_mask is not None:
        kpm = (key_padding_mask != 0).reshape(bsz, 1, 1, tk)
        kpm = jnp.broadcast_to(kpm, (bsz, H, 1, tk)).reshape(bsz * H, 1, tk)
        mask = mask | kpm
    bias = jnp.where(mask, -jnp.inf, 0.0)

    attn = jnp.einsum('bqd,bkd->bqk', q, k) + bias
    w = jax.nn.softmax(attn, axis=-1)
    out = jnp.einsum('bqk,bkd->bqd', w, v)                       # (B*H, Tq, HD)
    out = out.transpose(1, 0, 2).reshape(tq, bsz, e)             # (Tq, B, E)
    return out @ p['wo'].T + p['bo']


# ---------------------------------------------------------------------------
# Deterministic parameters
# ---------------------------------------------------------------------------
def make_attention_params(key, embed_dim=E):
    ks = jax.random.split(key, 8)
    wscale = 1.0 / math.sqrt(embed_dim)

    def w(k):
        return (wscale * jax.random.normal(k, (embed_dim, embed_dim))).astype(jnp.float32)

    def b(k):
        return (0.02 * jax.random.normal(k, (embed_dim,))).astype(jnp.float32)

    return {'wq': w(ks[0]), 'bq': b(ks[1]),
            'wk': w(ks[2]), 'bk': b(ks[3]),
            'wv': w(ks[4]), 'bv': b(ks[5]),
            'wo': w(ks[6]), 'bo': b(ks[7])}


if __name__ == "__main__":
    key0 = jax.random.PRNGKey(0)
    k_par, k_q = jax.random.split(key0)
    params = make_attention_params(k_par)

    # query (seq_len, batch, embed); self-attention -> key = query.
    query = jax.random.normal(k_q, (T, B, E), jnp.float32)
    key_t = query

    # attn_mask: 1.0 where future (causal); key_padding_mask: last 2 keys of batch 1.
    causal = jnp.triu(jnp.ones((T, T), jnp.float32), k=1)
    pad = jnp.zeros((B, T), jnp.float32).at[1, T - 2:].set(1.0)

    out = attention(query, key_t, pad, causal, params)
    out = jax.block_until_ready(out)

    ref = attention_reference(query, key_t, pad, causal, params)
    assert out.shape == (T, B, E)
    assert bool(jnp.all(jnp.isfinite(out)))
    max_err = float(jnp.max(jnp.abs(out - ref)))
    assert max_err < 1e-2, f"mismatch vs reference: {max_err}"

    print("KERNEL_OK")
</pallas_src>

<mosaic_0001>
module attributes {stable_mosaic.version = 11 : i64} {
  func.func @attention_kernel(%arg0: memref<2x8x32xf32, #tpu.memory_space<vmem>>, %arg1: memref<2x8x32xf32, #tpu.memory_space<vmem>>, %arg2: memref<2x8x8xf32, #tpu.memory_space<vmem>>, %arg3: memref<32x32xf32, #tpu.memory_space<vmem>>, %arg4: memref<1x32xf32, #tpu.memory_space<vmem>>, %arg5: memref<32x64xf32, #tpu.memory_space<vmem>>, %arg6: memref<1x64xf32, #tpu.memory_space<vmem>>, %arg7: memref<32x32xf32, #tpu.memory_space<vmem>>, %arg8: memref<1x32xf32, #tpu.memory_space<vmem>>, %arg9: memref<2x8x32xf32, #tpu.memory_space<vmem>>) attributes {dimension_semantics = [], scalar_prefetch = 0 : i64, scratch_operands = 0 : i64, tpu.core_type = #tpu.core_type<tc>} {
    %c0 = arith.constant 0 : index
    %c0_0 = arith.constant 0 : index
    %c0_1 = arith.constant 0 : index
    %0 = vector.load %arg0[%c0, %c0_0, %c0_1] : memref<2x8x32xf32, #tpu.memory_space<vmem>>, vector<2x8x32xf32>
    %1 = vector.shape_cast %0 : vector<2x8x32xf32> to vector<16x32xf32>
    %c0_2 = arith.constant 0 : index
    %c0_3 = arith.constant 0 : index
    %c0_4 = arith.constant 0 : index
    %2 = vector.load %arg1[%c0_2, %c0_3, %c0_4] : memref<2x8x32xf32, #tpu.memory_space<vmem>>, vector<2x8x32xf32>
    %3 = vector.shape_cast %2 : vector<2x8x32xf32> to vector<16x32xf32>
    %c0_5 = arith.constant 0 : index
    %c0_6 = arith.constant 0 : index
    %4 = vector.load %arg3[%c0_5, %c0_6] : memref<32x32xf32, #tpu.memory_space<vmem>>, vector<32x32xf32>
    %cst = arith.constant dense<0.000000e+00> : vector<16x32xf32>
    %5 = tpu.matmul %1, %4, %cst {dimension_numbers = #tpu.dot_dimension_numbers<[1], [0], [0], [1], [0, 0, 1, 1], [], []>} : vector<16x32xf32>, vector<32x32xf32>, vector<16x32xf32> -> vector<16x32xf32>
    %c0_7 = arith.constant 0 : index
    %c0_8 = arith.constant 0 : index
    %6 = vector.load %arg4[%c0_7, %c0_8] : memref<1x32xf32, #tpu.memory_space<vmem>>, vector<1x32xf32>
    %7 = vector.broadcast %6 : vector<1x32xf32> to vector<16x32xf32>
    %8 = arith.addf %5, %7 : vector<16x32xf32>
    %cst_9 = arith.constant 0.353553385 : f32
    %9 = vector.broadcast %cst_9 : f32 to vector<16x32xf32>
    %10 = arith.mulf %8, %9 : vector<16x32xf32>
    %c0_10 = arith.constant 0 : index
    %c0_11 = arith.constant 0 : index
    %11 = vector.load %arg5[%c0_10, %c0_11] : memref<32x64xf32, #tpu.memory_space<vmem>>, vector<32x64xf32>
    %cst_12 = arith.constant dense<0.000000e+00> : vector<16x64xf32>
    %12 = tpu.matmul %3, %11, %cst_12 {dimension_numbers = #tpu.dot_dimension_numbers<[1], [0], [0], [1], [0, 0, 1, 1], [], []>} : vector<16x32xf32>, vector<32x64xf32>, vector<16x64xf32> -> vector<16x64xf32>
    %c0_13 = arith.constant 0 : index
    %c0_14 = arith.constant 0 : index
    %13 = vector.load %arg6[%c0_13, %c0_14] : memref<1x64xf32, #tpu.memory_space<vmem>>, vector<1x64xf32>
    %14 = vector.broadcast %13 : vector<1x64xf32> to vector<16x64xf32>
    %15 = arith.addf %12, %14 : vector<16x64xf32>
    %16 = vector.shape_cast %10 : vector<16x32xf32> to vector<2x8x32xf32>
    %17 = vector.extract_strided_slice %15 {offsets = [0, 0], sizes = [16, 32], strides = [1, 1]} : vector<16x64xf32> to vector<16x32xf32>
    %18 = vector.shape_cast %17 : vector<16x32xf32> to vector<2x8x32xf32>
    %19 = vector.extract_strided_slice %15 {offsets = [0, 32], sizes = [16, 32], strides = [1, 1]} : vector<16x64xf32> to vector<16x32xf32>
    %20 = vector.shape_cast %19 : vector<16x32xf32> to vector<2x8x32xf32>
    %21 = vector.extract_strided_slice %16 {offsets = [0, 0, 0], sizes = [2, 8, 8], strides = [1, 1, 1]} : vector<2x8x32xf32> to vector<2x8x8xf32>
    %22 = vector.extract_strided_slice %16 {offsets = [0, 0, 8], sizes = [2, 8, 8], strides = [1, 1, 1]} : vector<2x8x32xf32> to vector<2x8x8xf32>
    %23 = vector.extract_strided_slice %16 {offsets = [0, 0, 16], sizes = [2, 8, 8], strides = [1, 1, 1]} : vector<2x8x32xf32> to vector<2x8x8xf32>
    %24 = vector.extract_strided_slice %16 {offsets = [0, 0, 24], sizes = [2, 8, 8], strides = [1, 1, 1]} : vector<2x8x32xf32> to vector<2x8x8xf32>
    %25 = tpu.concatenate %21, %22, %23, %24 in 0 : vector<2x8x8xf32>, vector<2x8x8xf32>, vector<2x8x8xf32>, vector<2x8x8xf32> -> vector<8x8x8xf32>
    %26 = vector.extract_strided_slice %18 {offsets = [0, 0, 0], sizes = [2, 8, 8], strides = [1, 1, 1]} : vector<2x8x32xf32> to vector<2x8x8xf32>
    %27 = vector.extract_strided_slice %18 {offsets = [0, 0, 8], sizes = [2, 8, 8], strides = [1, 1, 1]} : vector<2x8x32xf32> to vector<2x8x8xf32>
    %28 = vector.extract_strided_slice %18 {offsets = [0, 0, 16], sizes = [2, 8, 8], strides = [1, 1, 1]} : vector<2x8x32xf32> to vector<2x8x8xf32>
    %29 = vector.extract_strided_slice %18 {offsets = [0, 0, 24], sizes = [2, 8, 8], strides = [1, 1, 1]} : vector<2x8x32xf32> to vector<2x8x8xf32>
    %30 = tpu.concatenate %26, %27, %28, %29 in 0 : vector<2x8x8xf32>, vector<2x8x8xf32>, vector<2x8x8xf32>, vector<2x8x8xf32> -> vector<8x8x8xf32>
    %31 = vector.extract_strided_slice %20 {offsets = [0, 0, 0], sizes = [2, 8, 8], strides = [1, 1, 1]} : vector<2x8x32xf32> to vector<2x8x8xf32>
    %32 = vector.extract_strided_slice %20 {offsets = [0, 0, 8], sizes = [2, 8, 8], strides = [1, 1, 1]} : vector<2x8x32xf32> to vector<2x8x8xf32>
    %33 = vector.extract_strided_slice %20 {offsets = [0, 0, 16], sizes = [2, 8, 8], strides = [1, 1, 1]} : vector<2x8x32xf32> to vector<2x8x8xf32>
    %34 = vector.extract_strided_slice %20 {offsets = [0, 0, 24], sizes = [2, 8, 8], strides = [1, 1, 1]} : vector<2x8x32xf32> to vector<2x8x8xf32>
    %35 = tpu.concatenate %31, %32, %33, %34 in 0 : vector<2x8x8xf32>, vector<2x8x8xf32>, vector<2x8x8xf32>, vector<2x8x8xf32> -> vector<8x8x8xf32>
    %c0_15 = arith.constant 0 : index
    %c0_16 = arith.constant 0 : index
    %c0_17 = arith.constant 0 : index
    %36 = vector.load %arg2[%c0_15, %c0_16, %c0_17] : memref<2x8x8xf32, #tpu.memory_space<vmem>>, vector<2x8x8xf32>
    %37 = tpu.concatenate %36, %36, %36, %36 in 0 : vector<2x8x8xf32>, vector<2x8x8xf32>, vector<2x8x8xf32>, vector<2x8x8xf32> -> vector<8x8x8xf32>
    "tpu.trace_start"() <{level = 10 : i32, message = "bqd,bkd->bqk"}> : () -> ()
    %cst_18 = arith.constant dense<0.000000e+00> : vector<8x8x8xf32>
    %38 = tpu.matmul %25, %30, %cst_18 {dimension_numbers = #tpu.dot_dimension_numbers<[2], [2], [1], [1], [0, 0, 0, 1, 1, 1], [0], [0]>} : vector<8x8x8xf32>, vector<8x8x8xf32>, vector<8x8x8xf32> -> vector<8x8x8xf32>
    "tpu.trace_stop"() : () -> ()
    %39 = arith.addf %38, %37 : vector<8x8x8xf32>
    %cst_19 = arith.constant dense<0xFF800000> : vector<8x8xf32>
    %40 = vector.multi_reduction <maximumf>, %39, %cst_19 [2] : vector<8x8x8xf32> to vector<8x8xf32>
    %41 = vector.shape_cast %40 : vector<8x8xf32> to vector<8x8x1xf32>
    %42 = vector.broadcast %41 : vector<8x8x1xf32> to vector<8x8x8xf32>
    %43 = arith.subf %39, %42 : vector<8x8x8xf32>
    %44 = math.exp %43 : vector<8x8x8xf32>
    %cst_20 = arith.constant dense<0.000000e+00> : vector<8x8xf32>
    %45 = vector.multi_reduction <add>, %44, %cst_20 [2] : vector<8x8x8xf32> to vector<8x8xf32>
    %46 = vector.shape_cast %45 : vector<8x8xf32> to vector<8x8x1xf32>
    %47 = tpu.reciprocal %46 {approx = true} : vector<8x8x1xf32> -> vector<8x8x1xf32>
    %48 = vector.broadcast %47 : vector<8x8x1xf32> to vector<8x8x8xf32>
    %49 = arith.mulf %44, %48 : vector<8x8x8xf32>
    "tpu.trace_start"() <{level = 10 : i32, message = "bqk,bkd->bqd"}> : () -> ()
    %cst_21 = arith.constant dense<0.000000e+00> : vector<8x8x8xf32>
    %50 = tpu.matmul %49, %35, %cst_21 {dimension_numbers = #tpu.dot_dimension_numbers<[2], [1], [1], [2], [0, 0, 0, 1, 1, 2], [0], [0]>} : vector<8x8x8xf32>, vector<8x8x8xf32>, vector<8x8x8xf32> -> vector<8x8x8xf32>
    "tpu.trace_stop"() : () -> ()
    %51 = vector.extract_strided_slice %50 {offsets = [0, 0, 0], sizes = [2, 8, 8], strides = [1, 1, 1]} : vector<8x8x8xf32> to vector<2x8x8xf32>
    %52 = vector.extract_strided_slice %50 {offsets = [2, 0, 0], sizes = [2, 8, 8], strides = [1, 1, 1]} : vector<8x8x8xf32> to vector<2x8x8xf32>
    %53 = vector.extract_strided_slice %50 {offsets = [4, 0, 0], sizes = [2, 8, 8], strides = [1, 1, 1]} : vector<8x8x8xf32> to vector<2x8x8xf32>
    %54 = vector.extract_strided_slice %50 {offsets = [6, 0, 0], sizes = [2, 8, 8], strides = [1, 1, 1]} : vector<8x8x8xf32> to vector<2x8x8xf32>
    %55 = tpu.concatenate %51, %52, %53, %54 in 2 : vector<2x8x8xf32>, vector<2x8x8xf32>, vector<2x8x8xf32>, vector<2x8x8xf32> -> vector<2x8x32xf32>
    %56 = vector.shape_cast %55 : vector<2x8x32xf32> to vector<16x32xf32>
    %c0_22 = arith.constant 0 : index
    %c0_23 = arith.constant 0 : index
    %57 = vector.load %arg7[%c0_22, %c0_23] : memref<32x32xf32, #tpu.memory_space<vmem>>, vector<32x32xf32>
    %cst_24 = arith.constant dense<0.000000e+00> : vector<16x32xf32>
    %58 = tpu.matmul %56, %57, %cst_24 {dimension_numbers = #tpu.dot_dimension_numbers<[1], [0], [0], [1], [0, 0, 1, 1], [], []>} : vector<16x32xf32>, vector<32x32xf32>, vector<16x32xf32> -> vector<16x32xf32>
    %c0_25 = arith.constant 0 : index
    %c0_26 = arith.constant 0 : index
    %59 = vector.load %arg8[%c0_25, %c0_26] : memref<1x32xf32, #tpu.memory_space<vmem>>, vector<1x32xf32>
    %60 = vector.broadcast %59 : vector<1x32xf32> to vector<16x32xf32>
    %61 = arith.addf %58, %60 : vector<16x32xf32>
    %62 = vector.shape_cast %61 : vector<16x32xf32> to vector<2x8x32xf32>
    %c0_27 = arith.constant 0 : index
    %c0_28 = arith.constant 0 : index
    %c0_29 = arith.constant 0 : index
    %63 = vector.load %arg9[%c0_27, %c0_28, %c0_29] : memref<2x8x32xf32, #tpu.memory_space<vmem>>, vector<2x8x32xf32>
    tpu.vector_store %arg9[%c0_27, %c0_28, %c0_29], %62 {strides = array<i32>} : memref<2x8x32xf32, #tpu.memory_space<vmem>>, vector<2x8x32xf32>,
    return
  }
}

</mosaic_0001>

<bundles_post_ra>
// kernel: tpu_custom_call.1
= control target key start
LH: loop header
LB: loop body
LE: loop exit
PB: predicated region body
PF: predicated region fallthrough
CT: control target
= control target key end

     0   :  { %14 = vsyncpa [#allocation3], 0  ;;  %s2446_s0 = inlined_call_operand.hbm [shape: f32[2,8,32], index: 0, kind: input, shape index: {}]   ;;  %s2447_s1 = inlined_call_operand.hbm [shape: f32[2,8,32], index: 1, kind: input, shape index: {}]   ;;  %s2448_s2 = inlined_call_operand.hbm [shape: f32[2,8,8], index: 2, kind: input, shape index: {}]   ;;  %s2449_s3 = inlined_call_operand.hbm [shape: f32[32,32], index: 3, kind: input, shape index: {}]   ;;  %s2450_s4 = inlined_call_operand.vmem [shape: f32[1,32], index: 4, kind: input, shape index: {}]   ;;  %s2451_s5 = inlined_call_operand.hbm [shape: f32[32,64], index: 5, kind: input, shape index: {}]   ;;  %s2452_s6 = inlined_call_operand.vmem [shape: f32[1,64], index: 6, kind: input, shape index: {}]   ;;  %s2453_s7 = inlined_call_operand.hbm [shape: f32[32,32], index: 7, kind: input, shape index: {}]   ;;  %s2454_s8 = inlined_call_operand.vmem [shape: f32[1,32], index: 8, kind: input, shape index: {}]   ;;  %s2455_s9 = inlined_call_operand.hbm [shape: f32[2,8,32], index: 9, kind: output, shape index: {}]  }
   0x1   :  { %15 = vsyncpa [#allocation6], 0 }
   0x2   :  { %16 = vsyncpa [#allocation9], 0 }
   0x3   :  { %17 = vsyncpa [#allocation12], 0 }
   0x4   :  { %18 = vsyncpa [#allocation4], 0  ;;  %s2166_s30 = smov [#allocation5]   ;;  %s2167_s11 = smov [#allocation8]  }
   0x5   :  { %s36_s10 = sshll.u32 %s2166_s30, 4  ;;  %s60_s12 = sshll.u32 %s2167_s11, 4  ;;  %s37_s10 = int_to_ptr.vmem [resolvable:$true] %s36_s10  ;;  %s61_s12 = int_to_ptr.vmem [resolvable:$true] %s60_s12 }
   0x6   :  { %s2024_s13 = scalar_lea.vmem %s37_s10, 256  ;;  %p2029_p1 = scmp.lt.s32.totalorder %s37_s10, %s37_s10 }
   0x7   :  { %p2025_p0 = scmp.ne.s32.totalorder %s37_s10, %s2024_s13  ;;  %p2030_p2 = scmp.lt.s32.totalorder %s2024_s13, %s2024_s13 }
   0x9   :  { %p2031_p3 = por %p2030_p2, %p2029_p1 }
   0xb   :  { %p2032_p4 = pnand %p2031_p3, %p2025_p0 }
   0xd   :  { %2035 = shalt.err (!%p2032_p4)
}
   0xe   :  { %s2168_s14 = smov 128   ;;  %s2169_s15 = smov 8  }
   0xf   :  { %42 = dma.hbm_to_vmem [thread:$0]  %s2447_s1, 256, %s37_s10, [#allocation6], %s2168_s14, %s2168_s14, %s2169_s15  }
  0x10   :  { %s2044_s18 = scalar_lea.vmem %s61_s12, 512  ;;  %p2049_p6 = scmp.lt.s32.totalorder %s61_s12, %s61_s12 }
  0x11   :  { %p2045_p5 = scmp.ne.s32.totalorder %s61_s12, %s2044_s18  ;;  %p2050_p7 = scmp.lt.s32.totalorder %s2044_s18, %s2044_s18 }
  0x13   :  { %p2051_p8 = por %p2050_p7, %p2049_p6 }
  0x15   :  { %p2052_p9 = pnand %p2051_p8, %p2045_p5 }
  0x17   :  { %2055 = shalt.err (!%p2052_p9)
}
  0x18   :  { %66 = dma.hbm_to_vmem [thread:$0]  %s2449_s3, 512, %s61_s12, [#allocation9], %s2168_s14, %s2168_s14, %s2169_s15  }
  0x19   :  { %s2170_s21 = smov [#allocation2]   ;;  %s2171_s23 = smov [#allocation7]  }
  0x1a   :  { %s24_s22 = sshll.u32 %s2170_s21, 4  ;;  %s48_s24 = sshll.u32 %s2171_s23, 4  ;;  %s25_s22 = int_to_ptr.vmem [resolvable:$true] %s24_s22  ;;  %s49_s24 = int_to_ptr.vmem [resolvable:$true] %s48_s24 }
  0x1b   :  { %s2064_s1 = scalar_lea.vmem %s25_s22, 256  ;;  %p2069_p11 = scmp.lt.s32.totalorder %s25_s22, %s25_s22 }
  0x1c   :  { %p2065_p10 = scmp.ne.s32.totalorder %s25_s22, %s2064_s1  ;;  %p2070_p12 = scmp.lt.s32.totalorder %s2064_s1, %s2064_s1 }
  0x1e   :  { %p2071_p13 = por %p2070_p12, %p2069_p11 }
  0x20   :  { %p2072_p0 = pnand %p2071_p13, %p2065_p10 }
  0x22   :  { %2075 = shalt.err (!%p2072_p0)
}
  0x23   :  { %30 = dma.hbm_to_vmem [thread:$0]  %s2446_s0, 256, %s25_s22, [#allocation3], %s2168_s14, %s2168_s14, %s2169_s15  }
  0x24   :  { %s2084_s3 = scalar_lea.vmem %s49_s24, 256  ;;  %p2089_p2 = scmp.lt.s32.totalorder %s49_s24, %s49_s24 }
  0x25   :  { %p2085_p1 = scmp.ne.s32.totalorder %s49_s24, %s2084_s3  ;;  %p2090_p3 = scmp.lt.s32.totalorder %s2084_s3, %s2084_s3 }
  0x27   :  { %p2091_p4 = por %p2090_p3, %p2089_p2 }
  0x29   :  { %p2092_p5 = pnand %p2091_p4, %p2085_p1 }
  0x2b   :  { %2095 = shalt.err (!%p2092_p5)
}
  0x2c   :  { %54 = dma.hbm_to_vmem [thread:$0]  %s2448_s2, 256, %s49_s24, [#allocation6], %s2168_s14, %s2168_s14, %s2169_s15  }
  0x2d   :  { %s2172_s29 = smov [#allocation10]   ;;  %s2173_s10 = smov [#allocation11]  }
  0x2e   :  { %s74_s30 = sshll.u32 %s2172_s29, 4  ;;  %s88_s11 = sshll.u32 %s2173_s10, 4  ;;  %s75_s30 = int_to_ptr.vmem [resolvable:$true] %s74_s30  ;;  %s89_s11 = int_to_ptr.vmem [resolvable:$true] %s88_s11 }
  0x2f   :  { %s2104_s0 = scalar_lea.vmem %s75_s30, 512  ;;  %p2109_p7 = scmp.lt.s32.totalorder %s75_s30, %s75_s30 }
  0x30   :  { %p2105_p6 = scmp.ne.s32.totalorder %s75_s30, %s2104_s0  ;;  %p2110_p8 = scmp.lt.s32.totalorder %s2104_s0, %s2104_s0 }
  0x32   :  { %p2111_p9 = por %p2110_p8, %p2109_p7 }
  0x34   :  { %p2112_p10 = pnand %p2111_p9, %p2105_p6 }
  0x36   :  { %2115 = shalt.err (!%p2112_p10)
}
  0x37   :  { %80 = dma.hbm_to_vmem [thread:$0]  %s2451_s5, 512, %s75_s30, [#allocation9], %s2168_s14, %s2168_s14, %s2169_s15  }
  0x38   :  { %s2124_s2 = scalar_lea.vmem %s89_s11, 512  ;;  %p2129_p12 = scmp.lt.s32.totalorder %s89_s11, %s89_s11 }
  0x39   :  { %p2125_p11 = scmp.ne.s32.totalorder %s89_s11, %s2124_s2  ;;  %p2130_p13 = scmp.lt.s32.totalorder %s2124_s2, %s2124_s2 }
  0x3b   :  { %p2131_p0 = por %p2130_p13, %p2129_p12 }
  0x3d   :  { %p2132_p1 = pnand %p2131_p0, %p2125_p11 }
  0x3f   :  { %2135 = shalt.err (!%p2132_p1)
}
  0x40   :  { %94 = dma.hbm_to_vmem [thread:$0]  %s2453_s7, 512, %s89_s11, [#allocation12], %s2168_s14, %s2168_s14, %s2169_s15  }
  0x41   :  { %2156 = dma.done.wait [#allocation3], 256  }
  0x42   :  { %2157 = vsyncadd [#allocation3], 4294967040 }
  0x43   :  { %2158 = dma.done.wait [#allocation6], 512  }
  0x44   :  { %2159 = vsyncadd [#allocation6], 4294966784 }
  0x45   :  { %2160 = dma.done.wait [#allocation9], 1024  }
  0x46   :  { %2161 = vsyncadd [#allocation9], 4294966272 }
  0x47   :  { %2162 = dma.done.wait [#allocation12], 512  }
  0x48   :  { %2163 = vsyncadd [#allocation12], 4294966784  ;;  %v217_v0 = vld [vmem:[#allocation10 + $0x18] sm:$0xff]  ;;  %v216_v2 = vld [vmem:[#allocation10 + $0x10] sm:$0xff]  ;;  %vm130_vm0 = vcmask 261120   ;;  %v2174_v12 = vmov 0.0  }
  0x49   :  { %v122_v1 = vld [vmem:[#allocation8 + $0x18] sm:$0xff]  ;;  %1865 = vmatprep.subr.mxu1 %v217_v0  ;;  %v121_v3 = vld [vmem:[#allocation8 + $0x10] sm:$0xff]  ;;  %v215_v4 = vld [vmem:[#allocation10 + $0x8] sm:$0xff]  ;;  %vm2175_vm1 = vmmov 0   ;;  %vm336_vm2 = vcmask 64512   ;;  %s2176_s20 = smov 112  }
  0x4a   :  { %1854 = vmatprep.subr.mxu0 %v122_v1  ;;  %1866 = vmatpush3.msra.mxu1 %v217_v0  ;;  %v120_v5 = vld [vmem:[#allocation8 + $0x8] sm:$0xff]  ;;  %v214_v6 = vld [vmem:[#allocation10] sm:$0xff]  ;;  %v115_v9 = vld [vmem:[#allocation2] sm:$0xff]  ;;  %s2177_s21 = smov 120   ;;  %s2180_s22 = smov 16   ;;  %vm1651_vm3 = vcmask 130048  }
  0x4b   :  { %1855 = vmatpush3.msra.mxu0 %v122_v1  ;;  %1867 = vmatprep.subr.mxu1 %v216_v2  ;;  %v119_v7 = vld [vmem:[#allocation8] sm:$0xff]  ;;  %v118_v10 = vld [vmem:[#allocation5 + $0x8] sm:$0xff]  ;;  %v116_v11 = vld [vmem:[#allocation2 + $0x8] sm:$0xff]  ;;  %s2181_s23 = smov 24   ;;  %vm1654_vm4 = vcmask 195584   ;;  %s2182_s25 = smov [#allocation13]  }
  0x4c   :  { %1856 = vmatprep.subr.mxu0 %v121_v3  ;;  %1868 = vmatpush3.msra.mxu1 %v216_v2  ;;  %v117_v8 = vld [vmem:[#allocation5] sm:$0xff]  ;;  %v1774_v13 = vld [vmem:[%s2452_s6] ss:$0 sm:$0xff]  ;;  %v335_v41 = vld [vmem:[#allocation7 + $0x8] sm:$0xff]  ;;  %s2179_s6 = smov 96   ;;  %s1756_s26 = sshll.u32 %s2182_s25, 4  ;;  %s1757_s26 = int_to_ptr.vmem [resolvable:$true] %s1756_s26 }
  0x4d   :  { %1857 = vmatpush3.msra.mxu0 %v121_v3  ;;  %1869 = vmatprep.subr.mxu1 %v215_v4  ;;  %v1771_v14 = vld [vmem:[%s2450_s4] ss:$0 sm:$0xff]  ;;  %s2178_s4 = smov 104   ;;  %s2136_s3 = scalar_lea.vmem %s1757_s26, 256 }
  0x4e   :  { %1858 = vmatprep.subr.mxu0 %v120_v5  ;;  %1870 = vmatpush3.msra.mxu1 %v215_v4  ;;  %v334_v37 = vld [vmem:[#allocation7] sm:$0xff]  ;;  %p2137_p2 = scmp.ne.s32.totalorder %s1757_s26, %s2136_s3  ;;  %p2141_p3 = scmp.lt.s32.totalorder %s1757_s26, %s1757_s26 }
  0x4f   :  { %1859 = vmatpush3.msra.mxu0 %v120_v5  ;;  %1871 = vmatprep.subr.mxu1 %v214_v6  ;;  %p2142_p4 = scmp.lt.s32.totalorder %s2136_s3, %s2136_s3 }
  0x50   :  { %1860 = vmatprep.subr.mxu0 %v119_v7  ;;  %1872 = vmatpush3.msra.mxu1 %v214_v6 }
  0x51   :  { %1873 = vmatprep.mubr.msk.f32.mxu1 %vm130_vm0, %v117_v8  ;;  %1861 = vmatpush3.msra.mxu0 %v119_v7  ;;  %p2143_p5 = por %p2142_p4, %p2141_p3 }
  0x52   :  { %1862 = vmatprep.mubr.msk.f32.mxu0 %vm130_vm0, %v115_v9  ;;  %1874 = vmatmul.mubr.msk.f32.vlgmr.msra.gmra.mxu1 %vm130_vm0, %v118_v10 }
  0x53   :  { %1863 = vmatmul.mubr.msk.f32.vlgmr.msra.gmra.mxu0 %vm130_vm0, %v116_v11  ;;  %1876 = vmatprep.subr.mxu1 %v2174_v12  ;;  %p2144_p6 = pnand %p2143_p5, %p2137_p2 }
  0x54   :  { %1886 = vmatprep.subr.mxu0 %v2174_v12  ;;  %1878 = vmatprep.mubr.msk.f32.mxu1 %vm2175_vm1, %v2174_v12 }
  0x55   :  { %1888 = vmatprep.mubr.msk.f32.mxu0 %vm2175_vm1, %v2174_v12 }
 0x112   :  { %v1875_v15 = vpop.f32.mrf.mxu1 }
 0x113   :  { %v1864_v16 = vpop.f32.mrf.mxu0  ;;  %v2285_v17 = vadd.f32 %v1875_v15, %v1774_v13 }
 0x114   :  { %v209_v18 = vadd.f32 %v1864_v16, %v1771_v14  ;;  %v297_v19 = vpop.f32.mrf.mxu1 }
 0x115   :  { %v203_v20 = vpop.f32.mrf.mxu0  ;;  %v2287_v22 = vadd.f32 %v1774_v13, %v297_v19  ;;  %328 = vrot.lane.b32.xlu1 %v2285_v17, %s2176_s20  ;;  %324 = vrot.lane.b32.xlu0 %v2285_v17, %s2177_s21 }
 0x116   :  { %v213_v21 = vmul.f32 0.35355338, %v209_v18  ;;  %v204_v23 = vadd.f32 %v1771_v14, %v203_v20 }
 0x117   :  { %1877 = vmatpush3.xpose.msk.msra.mxu1 %vm336_vm2, %v2287_v22 }
 0x118   :  { %v212_v24 = vmul.f32 0.35355338, %v204_v23  ;;  %1881 = vmatprep.subr.mxu1 %v2174_v12 }
 0x119   :  { %322 = vrot.lane.b32.xlu0 %v2287_v22, %s2177_s21  ;;  %310 = vrot.lane.b32.xlu1 %v213_v21, %s2177_s21 }
 0x11a   :  { %1879 = vmatmul.mubr.msk.f32.vlgmr.msra.gmra.mxu1 %vm336_vm2, %v212_v24 }
 0x11b   :  { %1882 = vmatpush3.xpose.msk.msra.mxu1 %vm336_vm2, %v2285_v17  ;;  %1883 = vmatprep.mubr.msk.f32.mxu1 %vm2175_vm1, %v2174_v12 }
 0x11c   :  { %1891 = vmatprep.subr.mxu1 %v2174_v12 }
 0x11d   :  { %326 = vrot.lane.b32.xlu0 %v2287_v22, %s2176_s20  ;;  %308 = vrot.lane.b32.xlu1 %v212_v24, %s2177_s21 }
 0x11e   :  { %1884 = vmatmul.mubr.msk.f32.vlgmr.msra.gmra.mxu1 %vm336_vm2, %v213_v21 }
 0x11f   :  { %1893 = vmatprep.mubr.msk.f32.mxu1 %vm2175_vm1, %v2174_v12 }
 0x121   :  { %330 = vrot.lane.b32.xlu0 %v2287_v22, %s2178_s4  ;;  %314 = vrot.lane.b32.xlu1 %v213_v21, %s2176_s20 }
 0x125   :  { %312 = vrot.lane.b32.xlu0 %v212_v24, %s2176_s20  ;;  %332 = vrot.lane.b32.xlu1 %v2285_v17, %s2178_s4 }
 0x129   :  { %316 = vrot.lane.b32.xlu0 %v212_v24, %s2178_s4  ;;  %318 = vrot.lane.b32.xlu1 %v213_v21, %s2178_s4 }
 0x187   :  { %v2307_v25 = vpop.permute.xlu1 %328  ;;  %v2309_v26 = vpop.permute.xlu0 %324 }
 0x188   :  { %1892 = vmatpush3.xpose.msk.msra.mxu1 %vm336_vm2, %v2309_v26 }
 0x189   :  { %1901 = vmatprep.subr.mxu1 %v2174_v12 }
 0x18b   :  { %v2314_v27 = vpop.permute.xlu0 %322  ;;  %v311_v28 = vpop.permute.xlu1 %310 }
 0x18c   :  { %1887 = vmatpush3.xpose.msk.msra.mxu0 %vm336_vm2, %v2314_v27  ;;  %1894 = vmatmul.mubr.msk.f32.vlgmr.msra.gmra.mxu1 %vm336_vm2, %v311_v28 }
 0x18d   :  { %1902 = vmatpush3.xpose.msk.msra.mxu1 %vm336_vm2, %v2307_v25  ;;  %1896 = vmatprep.subr.mxu0 %v2174_v12 }
 0x18e   :  { %1903 = vmatprep.mubr.msk.f32.mxu1 %vm2175_vm1, %v2174_v12  ;;  %1911 = vmatprep.subr.mxu1 %v2174_v12 }
 0x18f   :  { %v2325_v29 = vpop.permute.xlu0 %326  ;;  %v309_v30 = vpop.permute.xlu1 %308 }
 0x190   :  { %1889 = vmatmul.mubr.msk.f32.vlgmr.msra.gmra.mxu0 %vm336_vm2, %v309_v30 }
 0x191   :  { %1897 = vmatpush3.xpose.msk.msra.mxu0 %vm336_vm2, %v2325_v29  ;;  %1898 = vmatprep.mubr.msk.f32.mxu0 %vm2175_vm1, %v2174_v12 }
 0x192   :  { %1906 = vmatprep.subr.mxu0 %v2174_v12 }
 0x193   :  { %v2333_v31 = vpop.permute.xlu0 %330  ;;  %v315_v32 = vpop.permute.xlu1 %314 }
 0x194   :  { %1904 = vmatmul.mubr.msk.f32.vlgmr.msra.gmra.mxu1 %vm336_vm2, %v315_v32 }
 0x195   :  { %1913 = vmatprep.mubr.msk.f32.mxu1 %vm2175_vm1, %v2174_v12 }
 0x197   :  { %v313_v33 = vpop.permute.xlu0 %312  ;;  %v2338_v34 = vpop.permute.xlu1 %332 }
 0x198   :  { %1899 = vmatmul.mubr.msk.f32.vlgmr.msra.gmra.mxu0 %vm336_vm2, %v313_v33  ;;  %1912 = vmatpush3.xpose.msk.msra.mxu1 %vm336_vm2, %v2338_v34 }
 0x199   :  { %1907 = vmatpush3.xpose.msk.msra.mxu0 %vm336_vm2, %v2333_v31  ;;  %1908 = vmatprep.mubr.msk.f32.mxu0 %vm2175_vm1, %v2174_v12 }
 0x19a   :  { %1916 = vmatprep.subr.mxu0 %v2174_v12  ;;  %1921 = vmatprep.subr.mxu1 %v2174_v12 }
 0x19b   :  { %v317_v35 = vpop.permute.xlu0 %316  ;;  %v319_v36 = vpop.permute.xlu1 %318 }
 0x19c   :  { %1909 = vmatmul.mubr.msk.f32.vlgmr.msra.gmra.mxu0 %vm336_vm2, %v317_v35  ;;  %1914 = vmatmul.mubr.msk.f32.vlgmr.msra.gmra.mxu1 %vm336_vm2, %v319_v36 }
 0x19d   :  { %1923 = vmatprep.mubr.msk.f32.mxu1 %vm2175_vm1, %v2174_v12  ;;  %1918 = vmatprep.mubr.msk.f32.mxu0 %vm2175_vm1, %v2174_v12 }
 0x1da   :  { %v407_v38 = vpop.f32.mrf.mxu1 }
 0x1db   :  { %v408_v39 = vadd.f32 %v407_v38, %v334_v37 }
 0x1dc   :  { %v1880_v40 = vpop.f32.mrf.mxu1 }
 0x1dd   :  { %v929_v42 = vsel %vm336_vm2, %v408_v39, -inf }
 0x1de   :  { %930 = vmax.xlane.f32.xlu0 %v929_v42  ;;  %v481_v43 = vpop.f32.mrf.mxu1 }
 0x1df   :  { %v482_v44 = vadd.f32 %v481_v43, %v335_v41 }
 0x1e0   :  { %v1885_v45 = vpop.f32.mrf.mxu1 }
 0x1e1   :  { %v932_v46 = vsel %vm336_vm2, %v482_v44, -inf }
 0x1e2   :  { %933 = vmax.xlane.f32.xlu1 %v932_v46 }
 0x24c   :  { %v629_v47 = vpop.f32.mrf.mxu1 }
 0x24d   :  { %v630_v52 = vadd.f32 %v629_v47, %v335_v41 }
 0x24e   :  { %v1895_v48 = vpop.f32.mrf.mxu1 }
 0x24f   :  { %v938_v57 = vsel %vm336_vm2, %v630_v52, -inf }
 0x250   :  { %v555_v49 = vpop.f32.mrf.mxu0 }
 0x251   :  { %v556_v50 = vadd.f32 %v555_v49, %v334_v37 }
 0x252   :  { %v1890_v51 = vpop.f32.mrf.mxu0 }
 0x253   :  { %v935_v53 = vsel %vm336_vm2, %v556_v50, -inf }
 0x254   :  { %936 = vmax.xlane.f32.xlu0 %v935_v53  ;;  %v777_v54 = vpop.f32.mrf.mxu1 }
 0x255   :  { %v778_v56 = vadd.f32 %v777_v54, %v335_v41 }
 0x256   :  { %v1905_v55 = vpop.f32.mrf.mxu1 }
 0x257   :  { %v944_v62 = vsel %vm336_vm2, %v778_v56, -inf }
 0x258   :  { %v703_v58 = vpop.f32.mrf.mxu0  ;;  %939 = vmax.xlane.f32.xlu0 %v938_v57 }
 0x259   :  { %v704_v59 = vadd.f32 %v703_v58, %v334_v37 }
 0x25a   :  { %v1900_v60 = vpop.f32.mrf.mxu0 }
 0x25b   :  { %v941_v61 = vsel %vm336_vm2, %v704_v59, -inf }
 0x25c   :  { %v851_v63 = vpop.f32.mrf.mxu0  ;;  %942 = vmax.xlane.f32.xlu1 %v941_v61  ;;  %945 = vmax.xlane.f32.xlu0 %v944_v62  ;;  %v925_v0 = vpop.f32.mrf.mxu1 }
 0x25d   :  { %v852_v1 = vadd.f32 %v851_v63, %v334_v37  ;;  %v926_v2 = vadd.f32 %v925_v0, %v335_v41 }
 0x25e   :  { %v1910_v3 = vpop.f32.mrf.mxu0  ;;  %v1915_v4 = vpop.f32.mrf.mxu1 }
 0x25f   :  { %v947_v5 = vsel %vm336_vm2, %v852_v1, -inf  ;;  %v950_v6 = vsel %vm336_vm2, %v926_v2, -inf }
 0x260   :  { %948 = vmax.xlane.f32.xlu1 %v947_v5  ;;  %951 = vmax.xlane.f32.xlu0 %v950_v6 }
 0x267   :  { %v931_v10 = vpop.xlane.xlu0 %930 }
 0x268   :  { %v953_v11 = vsub.f32 %v408_v39, %v931_v10 }
 0x26a   :  { %v961_v13 = vmul.f32 1.442695, %v953_v11 }
 0x26b   :  { %v934_v7 = vpop.xlane.xlu1 %933 }
 0x26c   :  { %v954_v8 = vsub.f32 %v482_v44, %v934_v7 }
 0x26e   :  { %v963_v9 = vmul.f32 1.442695, %v954_v8 }
 0x270   :  { %1984 = vpow2.f32 %v963_v9 }
 0x271   :  { %1017 = vrot.lane.b32.xlu1 %v2287_v22, %s2179_s6  ;;  %1986 = vpow2.f32 %v961_v13 }
 0x275   :  { %1169 = vrot.lane.b32.xlu1 %v2314_v27, %s2179_s6 }
 0x276   :  { %1093 = vrot.lane.b32.xlu0 %v2285_v17, %s2179_s6 }
 0x279   :  { %1245 = vrot.lane.b32.xlu1 %v2309_v26, %s2179_s6 }
 0x27a   :  { %1321 = vrot.lane.b32.xlu0 %v2325_v29, %s2179_s6 }
 0x27d   :  { %1397 = vrot.lane.b32.xlu1 %v2307_v25, %s2179_s6  ;;  %v2375_v14 = vpop.eup %1984 }
 0x27e   :  { %v980_v15 = vsel %vm336_vm2, %v2375_v14, 0.0  ;;  %v2379_v16 = vpop.eup %1986 }
 0x27f   :  { %v977_v17 = vsel %vm336_vm2, %v2379_v16, 0.0 }
 0x299   :  { %981 = vadd.xlane.f32.xlu0 %v980_v15 }
 0x2a1   :  { %978 = vadd.xlane.f32.xlu1 %v977_v17 }
 0x2dd   :  { %v937_v18 = vpop.xlane.xlu0 %936 }
 0x2de   :  { %v955_v19 = vsub.f32 %v556_v50, %v937_v18 }
 0x2e0   :  { %v965_v20 = vmul.f32 1.442695, %v955_v19 }
 0x2e1   :  { %v940_v21 = vpop.xlane.xlu0 %939 }
 0x2e2   :  { %1988 = vpow2.f32 %v965_v20  ;;  %v956_v22 = vsub.f32 %v630_v52, %v940_v21  ;;  %v1660_v21 = vld [vmem:[#allocation11 + $0x18] sm:$0xff] }
 0x2e4   :  { %v967_v23 = vmul.f32 1.442695, %v956_v22  ;;  %v1659_v22 = vld [vmem:[#allocation11 + $0x10] sm:$0xff] }
 0x2e5   :  { %v943_v24 = vpop.xlane.xlu1 %942  ;;  %v946_v25 = vpop.xlane.xlu0 %945 }
 0x2e6   :  { %1990 = vpow2.f32 %v967_v23  ;;  %v957_v26 = vsub.f32 %v704_v59, %v943_v24  ;;  %v958_v27 = vsub.f32 %v778_v56, %v946_v25  ;;  %v1658_v23 = vld [vmem:[#allocation11 + $0x8] sm:$0xff] }
 0x2e8   :  { %v969_v28 = vmul.f32 1.442695, %v957_v26  ;;  %v971_v29 = vmul.f32 1.442695, %v958_v27 }
 0x2e9   :  { %v949_v30 = vpop.xlane.xlu1 %948  ;;  %v952_v32 = vpop.xlane.xlu0 %951 }
 0x2ea   :  { %1992 = vpow2.f32 %v969_v28  ;;  %v959_v33 = vsub.f32 %v852_v1, %v949_v30  ;;  %v960_v35 = vsub.f32 %v926_v2, %v952_v32 }
 0x2eb   :  { %1994 = vpow2.f32 %v971_v29 }
 0x2ec   :  { %v973_v36 = vmul.f32 1.442695, %v959_v33  ;;  %v975_v37 = vmul.f32 1.442695, %v960_v35 }
 0x2ed   :  { %v1018_v38 = vpop.permute.xlu1 %1017  ;;  %v1094_v39 = vpop.permute.xlu0 %1093 }
 0x2ee   :  { %1996 = vpow2.f32 %v973_v36  ;;  %1917 = vmatpush3.msra.mxu0 %v1018_v38  ;;  %1922 = vmatpush3.msra.mxu1 %v1094_v39 }
 0x2ef   :  { %v1989_v40 = vpop.eup %1988  ;;  %1998 = vpow2.f32 %v975_v37  ;;  %1931 = vmatprep.subr.mxu1 %v2174_v12  ;;  %1926 = vmatprep.subr.mxu0 %v2174_v12 }
 0x2f0   :  { %v983_v41 = vsel %vm336_vm2, %v1989_v40, 0.0 }
 0x2f1   :  { %984 = vadd.xlane.f32.xlu1 %v983_v41  ;;  %v1170_v52 = vpop.permute.xlu1 %1169  ;;  %v1322_v53 = vpop.permute.xlu0 %1321 }
 0x2f3   :  { %v1991_v42 = vpop.eup %1990 }
 0x2f4   :  { %v986_v43 = vsel %vm336_vm2, %v1991_v42, 0.0 }
 0x2f5   :  { %987 = vadd.xlane.f32.xlu0 %v986_v43  ;;  %v1246_v54 = vpop.permute.xlu1 %1245 }
 0x2f7   :  { %v1993_v44 = vpop.eup %1992 }
 0x2f8   :  { %v1995_v45 = vpop.eup %1994  ;;  %v989_v46 = vsel %vm336_vm2, %v1993_v44, 0.0 }
 0x2f9   :  { %990 = vadd.xlane.f32.xlu1 %v989_v46  ;;  %v992_v47 = vsel %vm336_vm2, %v1995_v45, 0.0  ;;  %v1398_v56 = vpop.permute.xlu1 %1397 }
 0x2fa   :  { %993 = vadd.xlane.f32.xlu0 %v992_v47 }
 0x2fb   :  { %v2389_v48 = vpop.eup %1996 }
 0x2fc   :  { %v2391_v49 = vpop.eup %1998  ;;  %v995_v50 = vsel %vm336_vm2, %v2389_v48, 0.0 }
 0x2fd   :  { %996 = vadd.xlane.f32.xlu1 %v995_v50  ;;  %v998_v51 = vsel %vm336_vm2, %v2391_v49, 0.0  ;;  %v1801_v50 = vld [vmem:[%s2454_s8] ss:$0 sm:$0xff] }
 0x2fe   :  { %999 = vadd.xlane.f32.xlu0 %v998_v51 }
 0x30e   :  { %1549 = vrot.lane.b32.xlu1 %v2338_v34, %s2179_s6 }
 0x314   :  { %1473 = vrot.lane.b32.xlu0 %v2333_v31, %s2179_s6 }
 0x322   :  { %v982_v55 = vpop.xlane.xlu0 %981 }
 0x323   :  { %2000 = vrcp.f32 %v982_v55 }
 0x32a   :  { %v979_v57 = vpop.xlane.xlu1 %978 }
 0x32b   :  { %2002 = vrcp.f32 %v979_v57 }
 0x330   :  { %v2001_v58 = vpop.eup %2000 }
 0x331   :  { %v1010_v59 = vmul.f32 %v2001_v58, %v2375_v14 }
 0x333   :  { %1924 = vmatmul.mubr.msk.f32.vlgmr.msra.gmra.mxu1 %vm336_vm2, %v1010_v59 }
 0x334   :  { %1932 = vmatpush3.msra.mxu1 %v1246_v54  ;;  %1933 = vmatprep.mubr.msk.f32.mxu1 %vm2175_vm1, %v2174_v12 }
 0x335   :  { %1941 = vmatprep.subr.mxu1 %v2174_v12 }
 0x338   :  { %v2003_v31 = vpop.eup %2002 }
 0x339   :  { %v1009_v34 = vmul.f32 %v2003_v31, %v2379_v16 }
 0x33b   :  { %1919 = vmatmul.mubr.msk.f32.vlgmr.msra.gmra.mxu0 %vm336_vm2, %v1009_v34 }
 0x33c   :  { %1927 = vmatpush3.msra.mxu0 %v1170_v52  ;;  %1928 = vmatprep.mubr.msk.f32.mxu0 %vm2175_vm1, %v2174_v12 }
 0x33d   :  { %1936 = vmatprep.subr.mxu0 %v2174_v12 }
 0x37a   :  { %v985_v60 = vpop.xlane.xlu1 %984 }
 0x37b   :  { %2004 = vrcp.f32 %v985_v60 }
 0x37e   :  { %v988_v61 = vpop.xlane.xlu0 %987 }
 0x37f   :  { %2006 = vrcp.f32 %v988_v61 }
 0x382   :  { %v991_v62 = vpop.xlane.xlu1 %990 }
 0x383   :  { %2008 = vrcp.f32 %v991_v62  ;;  %v994_v63 = vpop.xlane.xlu0 %993 }
 0x384   :  { %2010 = vrcp.f32 %v994_v63 }
 0x386   :  { %v997_v0 = vpop.xlane.xlu1 %996 }
 0x387   :  { %2012 = vrcp.f32 %v997_v0  ;;  %v1000_v1 = vpop.xlane.xlu0 %999 }
 0x388   :  { %v2005_v2 = vpop.eup %2004  ;;  %2014 = vrcp.f32 %v1000_v1 }
 0x389   :  { %v1011_v3 = vmul.f32 %v2005_v2, %v1989_v40 }
 0x38a   :  { %v1550_v13 = vpop.permute.xlu1 %1549 }
 0x38b   :  { %1929 = vmatmul.mubr.msk.f32.vlgmr.msra.gmra.mxu0 %vm336_vm2, %v1011_v3  ;;  %v1474_v10 = vpop.permute.xlu0 %1473 }
 0x38c   :  { %v2007_v4 = vpop.eup %2006  ;;  %1937 = vmatpush3.msra.mxu0 %v1322_v53  ;;  %1938 = vmatprep.mubr.msk.f32.mxu0 %vm2175_vm1, %v2174_v12 }
 0x38d   :  { %v1012_v5 = vmul.f32 %v2007_v4, %v1991_v42  ;;  %1946 = vmatprep.subr.mxu0 %v2174_v12 }
 0x38f   :  { %1934 = vmatmul.mubr.msk.f32.vlgmr.msra.gmra.mxu1 %vm336_vm2, %v1012_v5 }
 0x390   :  { %v2009_v6 = vpop.eup %2008  ;;  %1942 = vmatpush3.msra.mxu1 %v1398_v56  ;;  %1943 = vmatprep.mubr.msk.f32.mxu1 %vm2175_vm1, %v2174_v12 }
 0x391   :  { %v2011_v7 = vpop.eup %2010  ;;  %1951 = vmatprep.subr.mxu1 %v2174_v12  ;;  %v1013_v8 = vmul.f32 %v2009_v6, %v1993_v44 }
 0x392   :  { %v1014_v9 = vmul.f32 %v2011_v7, %v1995_v45 }
 0x393   :  { %1939 = vmatmul.mubr.msk.f32.vlgmr.msra.gmra.mxu0 %vm336_vm2, %v1013_v8 }
 0x394   :  { %v2013_v11 = vpop.eup %2012  ;;  %1944 = vmatmul.mubr.msk.f32.vlgmr.msra.gmra.mxu1 %vm336_vm2, %v1014_v9  ;;  %1947 = vmatpush3.msra.mxu0 %v1474_v10 }
 0x395   :  { %v2015_v14 = vpop.eup %2014  ;;  %1952 = vmatpush3.msra.mxu1 %v1550_v13  ;;  %1948 = vmatprep.mubr.msk.f32.mxu0 %vm2175_vm1, %v2174_v12  ;;  %v1015_v15 = vmul.f32 %v2013_v11, %v2389_v48 }
 0x396   :  { %1953 = vmatprep.mubr.msk.f32.mxu1 %vm2175_vm1, %v2174_v12  ;;  %v1016_v16 = vmul.f32 %v2015_v14, %v2391_v49  ;;  %1956 = vmatprep.subr.mxu0 %v1660_v21  ;;  %v1657_v12 = vld [vmem:[#allocation11] sm:$0xff] }
 0x397   :  { %1949 = vmatmul.mubr.msk.f32.vlgmr.msra.gmra.mxu0 %vm336_vm2, %v1015_v15 }
 0x398   :  { %1954 = vmatmul.mubr.msk.f32.vlgmr.msra.gmra.mxu1 %vm336_vm2, %v1016_v16  ;;  %1957 = vmatpush3.msra.mxu0 %v1660_v21 }
 0x399   :  { %1958 = vmatprep.subr.mxu0 %v1659_v22 }
 0x39a   :  { %1959 = vmatpush3.msra.mxu0 %v1659_v22 }
 0x39b   :  { %1960 = vmatprep.subr.mxu0 %v1658_v23 }
 0x39c   :  { %1961 = vmatpush3.msra.mxu0 %v1658_v23 }
 0x39d   :  { %1962 = vmatprep.subr.mxu0 %v1657_v12 }
 0x39e   :  { %1963 = vmatpush3.msra.mxu0 %v1657_v12 }
 0x3f3   :  { %v1165_v17 = vpop.f32.mrf.mxu1 }
 0x3f5   :  { %v1925_v18 = vpop.f32.mrf.mxu1 }
 0x3fb   :  { %v1089_v19 = vpop.f32.mrf.mxu0 }
 0x3fd   :  { %v1920_v20 = vpop.f32.mrf.mxu0 }
 0x44b   :  { %v1241_v24 = vpop.f32.mrf.mxu0 }
 0x44c   :  { %1627 = vrot.lane.b32.xlu0 %v1241_v24, %s2169_s15 }
 0x44d   :  { %v1930_v25 = vpop.f32.mrf.mxu0 }
 0x44f   :  { %v1317_v26 = vpop.f32.mrf.mxu1 }
 0x450   :  { %1629 = vrot.lane.b32.xlu1 %v1317_v26, %s2169_s15 }
 0x451   :  { %v1935_v27 = vpop.f32.mrf.mxu1 }
 0x453   :  { %v1393_v28 = vpop.f32.mrf.mxu0 }
 0x454   :  { %v1469_v29 = vpop.f32.mrf.mxu1  ;;  %1635 = vrot.lane.b32.xlu0 %v1393_v28, %s2180_s22 }
 0x455   :  { %1637 = vrot.lane.b32.xlu1 %v1469_v29, %s2180_s22  ;;  %v1940_v30 = vpop.f32.mrf.mxu0 }
 0x456   :  { %v1945_v32 = vpop.f32.mrf.mxu1 }
 0x457   :  { %v1545_v33 = vpop.f32.mrf.mxu0 }
 0x458   :  { %v1621_v35 = vpop.f32.mrf.mxu1  ;;  %1643 = vrot.lane.b32.xlu0 %v1545_v33, %s2181_s23 }
 0x459   :  { %1645 = vrot.lane.b32.xlu1 %v1621_v35, %s2181_s23  ;;  %v1950_v36 = vpop.f32.mrf.mxu0 }
 0x45a   :  { %v1955_v37 = vpop.f32.mrf.mxu1 }
 0x4be   :  { %v1628_v38 = vpop.permute.xlu0 %1627 }
 0x4bf   :  { %v1649_v42 = vsel %vm336_vm2, %v1089_v19, %v1628_v38 }
 0x4c2   :  { %v1630_v39 = vpop.permute.xlu1 %1629 }
 0x4c3   :  { %v1650_v43 = vsel %vm336_vm2, %v1165_v17, %v1630_v39 }
 0x4c6   :  { %v1636_v40 = vpop.permute.xlu0 %1635 }
 0x4c7   :  { %v1638_v41 = vpop.permute.xlu1 %1637  ;;  %v1652_v44 = vsel %vm1651_vm3, %v1649_v42, %v1636_v40 }
 0x4c8   :  { %v1653_v46 = vsel %vm1651_vm3, %v1650_v43, %v1638_v41 }
 0x4ca   :  { %v1644_v45 = vpop.permute.xlu0 %1643 }
 0x4cb   :  { %v1655_v47 = vsel %vm1654_vm4, %v1652_v44, %v1644_v45  ;;  %v1646_v48 = vpop.permute.xlu1 %1645 }
 0x4cc   :  { %v1656_v49 = vsel %vm1654_vm4, %v1653_v46, %v1646_v48  ;;  %1964 = vmatprep.mubr.msk.f32.mxu0 %vm130_vm0, %v1655_v47 }
 0x4cd   :  { %1965 = vmatmul.mubr.msk.f32.vlgmr.msra.gmra.mxu0 %vm130_vm0, %v1656_v49 }
 0x58d   :  { %v1966_v51 = vpop.f32.mrf.mxu0 }
 0x58e   :  { %v1746_v52 = vadd.f32 %v1966_v51, %v1801_v50 }
 0x58f   :  { %v1740_v53 = vpop.f32.mrf.mxu0 }
 0x590   :  { %1750 = vst.msk [vmem:[#allocation13 + $0x8] sm:$0xff] %vm130_vm0, %v1746_v52  ;;  %v1741_v54 = vadd.f32 %v1801_v50, %v1740_v53 }
 0x592   :  { %1749 = vst.msk [vmem:[#allocation13] sm:$0xff] %vm130_vm0, %v1741_v54 }
 0x593   :  { %2147 = shalt.err (!%p2144_p6)
}
 0x594   :  { %1762 = dma.vmem_to_hbm [thread:$0]  %s1757_s26, 256, %s2455_s9, [#allocation4], %s2168_s14, %s2168_s14, %s2169_s15  }
 0x595   :  { %2164 = dma.done.wait [#allocation4], 256  }
 0x596   :  { %2165 = vsyncadd [#allocation4], 4294967040 }
 0x597   :  { %1766 = vsyncpa [#allocation3], 1 }
 0x598   :  { %1767 = vsyncpa [#allocation6], 1 }
 0x599   :  { %1768 = vsyncpa [#allocation9], 1 }
 0x59a   :  { %1769 = vsyncpa [#allocation12], 1 }
 0x59b   :  { %1770 = vsyncpa [#allocation4], 1 }

</bundles_post_ra>
